<compile_context>
chip_gen: v7x
topology: tpu7x:2x2x1
jax: 0.10.0
libtpu: 0.0.40
codegen_flags: <defaults>
</compile_context>

<pallas_src>
import math

import jax
import jax.numpy as jnp
from jax.experimental import pallas as pl
from jax.experimental.pallas import tpu as pltpu

_LANE_WIDTH = 1024      # slab width: multiple of 128 lanes (8 vregs wide)
_MAX_TILE_ROWS = 1024   # 1024 rows x 1024 lanes x 4 B = 4 MiB / buffer (f32)


def _copy_kernel(x_ref, o_ref):
    # Identity copy: this is the entire data movement of a reshape.
    o_ref[...] = x_ref[...]


def _pallas_identity_copy(flat_2d):
    """Tiled, lane-dense VMEM streaming copy of a 2D slab."""
    rows, cols = flat_2d.shape
    if rows <= _MAX_TILE_ROWS:
        # Single block along rows; block shape == full array dims, so the
        # (8, 128) divisibility constraint does not apply.
        tile_rows = rows
    else:
        # Multiple-of-8 row tile; last partial block is masked by Pallas.
        tile_rows = _MAX_TILE_ROWS

    grid = (pl.cdiv(rows, tile_rows),)
    itemsize = jnp.dtype(flat_2d.dtype).itemsize
    cost = pl.CostEstimate(
        flops=0,
        transcendentals=0,
        bytes_accessed=2 * rows * cols * itemsize,  # read + write of the slab
    )

    return pl.pallas_call(
        _copy_kernel,
        out_shape=jax.ShapeDtypeStruct((rows, cols), flat_2d.dtype),
        grid=grid,
        in_specs=[pl.BlockSpec((tile_rows, cols), lambda i: (i, 0))],
        out_specs=pl.BlockSpec((tile_rows, cols), lambda i: (i, 0)),
        compiler_params=pltpu.CompilerParams(
            # Independent row tiles: lets Mosaic shard across both v7x TCs.
            dimension_semantics=("parallel",),
            # in + out, double-buffered: 4 x 4 MiB = 16 MiB max; fits every gen.
            vmem_limit_bytes=32 * 1024 * 1024,
        ),
        cost_estimate=cost,
    )(flat_2d)


def reshape_forward(x, shape):
    """Equivalent of Reshape(shape).forward(x) == torch.reshape(x, (-1, *shape))."""
    target = (-1,) + tuple(shape)
    total = x.size
    trailing = math.prod(shape)
    assert trailing > 0 and total % trailing == 0, (
        "input not divisible into requested shape")

    # Row-major flatten (metadata only, matches torch.reshape on contiguous x).
    flat = jnp.reshape(x, (total,))

    # Present a wide lane-dense [rows, 1024] slab; pad the tail if the size is
    # not a multiple of the slab width (sliced off again after the copy).
    cols = _LANE_WIDTH
    padded_total = pl.cdiv(total, cols) * cols
    if padded_total != total:
        flat = jnp.pad(flat, (0, padded_total - total))
    flat_2d = jnp.reshape(flat, (padded_total // cols, cols))

    copied = _pallas_identity_copy(flat_2d)

    # Undo padding and apply the target shape (metadata-only glue).
    out_flat = jnp.reshape(copied, (padded_total,))
    if padded_total != total:
        out_flat = out_flat[:total]
    return jnp.reshape(out_flat, target)


if __name__ == "__main__":
    key = jax.random.PRNGKey(0)

    # Small NCHW-style input consistent with a RealNVP feature map.
    x = jax.random.normal(key, (2, 4, 16, 16), dtype=jnp.float32)

    # Reshape module configured to flatten per-sample: shape = (C*H*W,)
    shape = (4 * 16 * 16,)
    out = jax.block_until_ready(reshape_forward(x, shape))
    ref = jnp.reshape(x, (-1,) + shape)
    assert out.shape == (2, 1024), out.shape
    assert out.dtype == x.dtype
    assert bool(jnp.all(out == ref))

    # Multi-dim target shape, like Reshape((16, 64)).
    out2 = jax.block_until_ready(reshape_forward(x, (16, 64)))
    ref2 = jnp.reshape(x, (-1, 16, 64))
    assert out2.shape == (2, 16, 64), out2.shape
    assert bool(jnp.all(out2 == ref2))

    # Odd total size (not a multiple of the slab width): exercises the
    # pad-copy-slice path.
    x3 = jax.random.normal(jax.random.PRNGKey(1), (3, 5, 7), dtype=jnp.float32)
    out3 = jax.block_until_ready(reshape_forward(x3, (35,)))
    ref3 = jnp.reshape(x3, (-1, 35))
    assert out3.shape == (3, 35), out3.shape
    assert bool(jnp.all(out3 == ref3))

    # Moderately larger input: exercises the multi-tile (grid > 1) path with a
    # masked partial last block.
    x4 = jax.random.normal(jax.random.PRNGKey(2), (2, 3, 600, 600),
                           dtype=jnp.float32)
    out4 = jax.block_until_ready(reshape_forward(x4, (3 * 600 * 600,)))
    ref4 = jnp.reshape(x4, (-1, 3 * 600 * 600))
    assert out4.shape == (2, 3 * 600 * 600), out4.shape
    assert bool(jnp.all(out4 == ref4))

    print("KERNEL_OK")
</pallas_src>

<mosaic_0001>
module attributes {stable_mosaic.version = 11 : i64} {
  func.func @_copy_kernel(%arg0: i32, %arg1: memref<2x1024xf32, #tpu.memory_space<vmem>>, %arg2: memref<2x1024xf32, #tpu.memory_space<vmem>>) attributes {dimension_semantics = [#tpu.dimension_semantics<parallel>], iteration_bounds = array<i64: 1>, scalar_prefetch = 0 : i64, scratch_operands = 0 : i64, tpu.core_type = #tpu.core_type<tc>, window_params = [{transform_indices = @transform_0, window_bounds = array<i64: 2, 1024>}, {transform_indices = @transform_1, window_bounds = array<i64: 2, 1024>}]} {
    %c0 = arith.constant 0 : index
    %c0_0 = arith.constant 0 : index
    %0 = vector.load %arg1[%c0, %c0_0] : memref<2x1024xf32, #tpu.memory_space<vmem>>, vector<2x1024xf32>
    %c0_1 = arith.constant 0 : index
    %c0_2 = arith.constant 0 : index
    %1 = vector.load %arg2[%c0_1, %c0_2] : memref<2x1024xf32, #tpu.memory_space<vmem>>, vector<2x1024xf32>
    tpu.vector_store %arg2[%c0_1, %c0_2], %0 {strides = array<i32>} : memref<2x1024xf32, #tpu.memory_space<vmem>>, vector<2x1024xf32>,
    return
  }
  func.func @transform_0(%arg0: i32) -> (i32, i32) {
    %c0_i32 = arith.constant 0 : i32
    %c0_i32_0 = arith.constant 0 : i32
    return %arg0, %c0_i32 : i32, i32
  }
  func.func @transform_1(%arg0: i32) -> (i32, i32) {
    %c0_i32 = arith.constant 0 : i32
    %c0_i32_0 = arith.constant 0 : i32
    return %arg0, %c0_i32 : i32, i32
  }
}

</mosaic_0001>

<bundles_post_ra>
// kernel: tpu_custom_call.1
= control target key start
LH: loop header
LB: loop body
LE: loop exit
PB: predicated region body
PF: predicated region fallthrough
CT: control target
= control target key end

     0   :  { %6 = vsyncpa [#allocation3], 0  ;;  %s126_s0 = inlined_call_operand.hbm [shape: f32[2,1024], index: 0, kind: input, shape index: {}]   ;;  %s127_s1 = inlined_call_operand.hbm [shape: f32[2,1024], index: 1, kind: output, shape index: {}]  }
   0x1   :  { %7 = vsyncpa [#allocation4], 0  ;;  %s90_s6 = smov [#allocation2]   ;;  %s42_s10 = scalar_lea.hbm %s126_s0, 256 }
   0x2   :  { %s14_s7 = sshll.u32 %s90_s6, 4  ;;  %p43_p0 = scmp.ne.s32.totalorder %s126_s0, %s42_s10  ;;  %s15_s7 = int_to_ptr.vmem [resolvable:$true] %s14_s7 }
   0x3   :  { %p46_p1 = scmp.lt.u32.totalorder %s42_s10, %s126_s0 }
   0x5   :  { %p48_p2 = pnand %p46_p1, %p43_p0 }
   0x7   :  { %51 = shalt.err (!%p48_p2)
}
   0x8   :  { %s52_s15 = scalar_lea.vmem %s15_s7, 256  ;;  %p57_p4 = scmp.lt.s32.totalorder %s15_s7, %s15_s7 }
   0x9   :  { %p53_p3 = scmp.ne.s32.totalorder %s15_s7, %s52_s15  ;;  %p58_p5 = scmp.lt.s32.totalorder %s52_s15, %s52_s15 }
   0xb   :  { %p59_p6 = por %p58_p5, %p57_p4 }
   0xd   :  { %p60_p7 = pnand %p59_p6, %p53_p3 }
   0xf   :  { %63 = shalt.err (!%p60_p7)
}
  0x10   :  { %17 = dma.hbm_to_vmem [thread:$0]  %s126_s0, 256, %s15_s7, [#allocation3]  }
  0x11   :  { %86 = dma.done.wait [#allocation3], 256  }
  0x12   :  { %87 = vsyncadd [#allocation3], 4294967040  ;;  %s91_s18 = smov [#allocation5]   ;;  %v21_v0 = vld [vmem:[#allocation2] sm:$0xff]  ;;  %v22_v1 = vld [vmem:[#allocation2 + $0x8] sm:$0xff] }
  0x13   :  { %s31_s19 = sshll.u32 %s91_s18, 4  ;;  %23 = vst [vmem:[#allocation5] sm:$0xff] %v21_v0  ;;  %24 = vst [vmem:[#allocation5 + $0x8] sm:$0xff] %v22_v1  ;;  %s32_s19 = int_to_ptr.vmem [resolvable:$true] %s31_s19 }
  0x14   :  { %s64_s20 = scalar_lea.vmem %s32_s19, 256  ;;  %p69_p9 = scmp.lt.s32.totalorder %s32_s19, %s32_s19 }
  0x15   :  { %p65_p8 = scmp.ne.s32.totalorder %s32_s19, %s64_s20  ;;  %p70_p10 = scmp.lt.s32.totalorder %s64_s20, %s64_s20 }
  0x17   :  { %p71_p11 = por %p70_p10, %p69_p9 }
  0x19   :  { %p72_p12 = pnand %p71_p11, %p65_p8 }
  0x1b   :  { %75 = shalt.err (!%p72_p12)
}
  0x1c   :  { %s76_s0 = scalar_lea.hbm %s127_s1, 256 }
  0x1d   :  { %p77_p13 = scmp.ne.s32.totalorder %s127_s1, %s76_s0  ;;  %p80_p0 = scmp.lt.u32.totalorder %s76_s0, %s127_s1 }
  0x1f   :  { %p82_p1 = pnand %p80_p0, %p77_p13 }
  0x21   :  { %85 = shalt.err (!%p82_p1)
}
  0x22   :  { %34 = dma.vmem_to_hbm [thread:$0]  %s32_s19, 256, %s127_s1, [#allocation4]  }
  0x23   :  { %88 = dma.done.wait [#allocation4], 256  }
  0x24   :  { %89 = vsyncadd [#allocation4], 4294967040 }
  0x25   :  { %38 = vsyncpa [#allocation3], 1 }
  0x26   :  { %39 = vsyncpa [#allocation4], 1 }

</bundles_post_ra>
